<compile_context>
chip_gen: v5e
topology: v5e:2x2
jax: 0.10.0
libtpu: 0.0.40
codegen_flags: <defaults>
</compile_context>

<pallas_src>
import jax
import jax.numpy as jnp
from jax.experimental import pallas as pl
from jax.experimental.pallas import tpu as pltpu


_LANES = 128          # full lane width -> unmasked vector stores
_MAX_TILE_ROWS = 1024  # 1024 x 128 f32 = 512 KiB/tile; (in+out) x 2 bufs = 2 MiB VMEM


def _identity_kernel(x_ref, o_ref):
    # Abstract base class has no parameters / math; pass-through on the VPU.
    o_ref[...] = x_ref[...]


def _round_up(x: int, m: int) -> int:
    return ((x + m - 1) // m) * m


def sequence_classification_encoder_forward(sample: jax.Array) -> jax.Array:
    """Pallas stand-in for SequenceClassificationEncoder.forward (identity).

    In production this should simply `return sample`; the Pallas copy below is
    kept as the kernel exercise, reshaped to a lane-dense 2D slab and tiled
    large so per-grid-step overhead and masked stores do not dominate.
    """
    orig_shape = sample.shape
    orig_dtype = sample.dtype
    total = int(sample.size)

    # Flatten to a lane-dense (rows, 128) view, padding only if necessary.
    flat = sample.reshape(-1)
    rows = pl.cdiv(total, _LANES)
    rows = _round_up(rows, 8)                    # sublane (8) alignment
    tile_rows = min(_MAX_TILE_ROWS, rows)        # biggest tile that makes sense
    rows = _round_up(rows, tile_rows)            # grid divides evenly
    padded_total = rows * _LANES
    if padded_total != total:
        flat = jnp.pad(flat, (0, padded_total - total))
    x2d = flat.reshape(rows, _LANES)

    grid = (rows // tile_rows,)
    spec = pl.BlockSpec((tile_rows, _LANES), lambda i: (i, 0))

    out2d = pl.pallas_call(
        _identity_kernel,
        out_shape=jax.ShapeDtypeStruct((rows, _LANES), orig_dtype),
        grid_spec=pltpu.PrefetchScalarGridSpec(
            num_scalar_prefetch=0,
            grid=grid,
            in_specs=[spec],
            out_specs=spec,
        ),
        compiler_params=pltpu.CompilerParams(
            # "parallel" lets the grid shard across both TensorCores on v7x;
            # no-op on single-TC v5e/v6e.
            dimension_semantics=("parallel",),
            # Generous but safe on every generation (v7x physical VMEM = 64 MiB).
            vmem_limit_bytes=32 * 1024 * 1024,
        ),
    )(x2d)

    return out2d.reshape(-1)[:total].reshape(orig_shape)


if __name__ == "__main__":
    key = jax.random.PRNGKey(0)
    B, T, D = 2, 8, 32  # small shapes consistent with a sequence-encoder input
    sample = jax.random.normal(key, (B, T, D), dtype=jnp.float32)

    out = sequence_classification_encoder_forward(sample)
    out = jax.block_until_ready(out)

    # Identity semantics check (the only defined behavior of the base class).
    assert out.shape == sample.shape
    assert out.dtype == sample.dtype
    assert jnp.allclose(out, sample)

    print("KERNEL_OK")
</pallas_src>

<mosaic_0001>
module attributes {stable_mosaic.version = 11 : i64} {
  func.func @_identity_kernel(%arg0: i32, %arg1: memref<8x128xf32, #tpu.memory_space<vmem>>, %arg2: memref<8x128xf32, #tpu.memory_space<vmem>>) attributes {dimension_semantics = [#tpu.dimension_semantics<parallel>], iteration_bounds = array<i64: 1>, scalar_prefetch = 0 : i64, scratch_operands = 0 : i64, tpu.core_type = #tpu.core_type<tc>, window_params = [{transform_indices = @transform_0, window_bounds = array<i64: 8, 128>}, {transform_indices = @transform_1, window_bounds = array<i64: 8, 128>}]} {
    %c0 = arith.constant 0 : index
    %c0_0 = arith.constant 0 : index
    %0 = vector.load %arg1[%c0, %c0_0] : memref<8x128xf32, #tpu.memory_space<vmem>>, vector<8x128xf32>
    %c0_1 = arith.constant 0 : index
    %c0_2 = arith.constant 0 : index
    %1 = vector.load %arg2[%c0_1, %c0_2] : memref<8x128xf32, #tpu.memory_space<vmem>>, vector<8x128xf32>
    tpu.vector_store %arg2[%c0_1, %c0_2], %0 {strides = array<i32>} : memref<8x128xf32, #tpu.memory_space<vmem>>, vector<8x128xf32>,
    return
  }
  func.func @transform_0(%arg0: i32) -> (i32, i32) {
    %c0_i32 = arith.constant 0 : i32
    %c0_i32_0 = arith.constant 0 : i32
    return %arg0, %c0_i32 : i32, i32
  }
  func.func @transform_1(%arg0: i32) -> (i32, i32) {
    %c0_i32 = arith.constant 0 : i32
    %c0_i32_0 = arith.constant 0 : i32
    return %arg0, %c0_i32 : i32, i32
  }
}

</mosaic_0001>

<bundles_post_ra>
// kernel: tpu_custom_call.1
= control target key start
LH: loop header
LB: loop body
LE: loop exit
PB: predicated region body
PF: predicated region fallthrough
CT: control target
= control target key end

     0   :  { %6 = vsyncpa [#allocation3], 0  ;;  %s114_s0 = inlined_call_operand.hbm [shape: f32[8,128], index: 0, kind: input, shape index: {}]   ;;  %s115_s1 = inlined_call_operand.hbm [shape: f32[8,128], index: 1, kind: output, shape index: {}]  }
   0x1   :  { %7 = vsyncpa [#allocation4], 0  ;;  %s13_s8 = sshll.u32 %s114_s0, 4  ;;  %s96_s9 = smov [#allocation2]   ;;  %s14_s8 = int_to_ptr.hbm [resolvable:$true] %s13_s8 }
   0x2   :  { %s15_s10 = sshll.u32 %s96_s9, 4  ;;  %s16_s10 = int_to_ptr.vmem [resolvable:$true] %s15_s10 }
   0x3   :  { %18 = dma.hbm_to_vmem [thread:$0]  %s14_s8, 128, %s16_s10, [#allocation3]  }
   0x4   :  { %92 = dma.done.wait [#allocation3], 128  }
   0x5   :  { %93 = vsyncadd [#allocation3], 4294967168  ;;  %s97_s11 = smov [#allocation5]   ;;  %s32_s15 = sshll.u32 %s115_s1, 4  ;;  %v23_v0 = vld [vmem:[#allocation2] sm:$0xff]  ;;  %s33_s15 = int_to_ptr.hbm [resolvable:$true] %s32_s15 }
   0x6   :  { %s30_s12 = sshll.u32 %s97_s11, 4  ;;  %24 = vst [vmem:[#allocation5] sm:$0xff] %v23_v0  ;;  %s31_s12 = int_to_ptr.vmem [resolvable:$true] %s30_s12 }
   0x7   :  { %35 = dma.vmem_to_hbm [thread:$0]  %s31_s12, 128, %s33_s15, [#allocation4]  }
   0x8   :  { %94 = dma.done.wait [#allocation4], 128  }
   0x9   :  { %95 = vsyncadd [#allocation4], 4294967168 }
   0xa   :  { %40 = vsyncpa [#allocation3], 1 }
   0xb   :  { %41 = vsyncpa [#allocation4], 1 }

</bundles_post_ra>
